<compile_context>
chip_gen: v6e
topology: v6e:2x2x1
jax: 0.10.0
libtpu: 0.0.40
codegen_flags: <defaults>
</compile_context>

<pallas_src>
import jax
import jax.numpy as jnp
from jax.experimental import pallas as pl
from jax.experimental.pallas import tpu as pltpu


def ffn_kernel(x_ref, w1_ref, b1_ref, w2_ref, b2_ref, o_ref):
    # x_ref:  (tm, d_model)        compute dtype (f32 or bf16)
    # w1_ref: (d_model, d_ff)      compute dtype
    # b1_ref: (1, d_ff)            f32
    # w2_ref: (d_ff, d_model)      compute dtype
    # b2_ref: (1, d_model)         f32
    # o_ref:  (tm, d_model)        original input dtype
    x = x_ref[...]

    # First matmul on the MXU, f32 accumulation.
    h = jnp.dot(x, w1_ref[...], preferred_element_type=jnp.float32)
    # Bias + ReLU stay in f32 vregs (no bf16 VPU path on v5e).
    h = jnp.maximum(h + b1_ref[...], 0.0)

    # dropout (eval mode) == identity.

    # Second matmul on the MXU, f32 accumulation; bias added once, in f32.
    y = jnp.dot(h.astype(w2_ref.dtype), w2_ref[...],
                preferred_element_type=jnp.float32)
    y = y + b2_ref[...]
    o_ref[...] = y.astype(o_ref.dtype)


def _choose_row_tile(M, sublane, max_tm=512):
    """Row tile: multiple of the sublane tile, capped, and split so that the
    'parallel' M axis has >= 2 grid steps whenever possible (pipelining +
    v7x megacore)."""
    tm = min(max_tm, M)
    tm = max(sublane, (tm // sublane) * sublane)
    if M // tm < 2 and M >= 2 * sublane:
        tm = max(sublane, ((M // 2) // sublane) * sublane)
    return tm


def positionwise_ffn(x, w1, b1, w2, b2, *, compute_dtype=None, max_tm=512):
    """x: (batch, seq, d_model). Returns (batch, seq, d_model) in x.dtype."""
    orig_dtype = x.dtype
    batch, seq, d_model = x.shape
    d_ff = w1.shape[1]
    M = batch * seq

    cdt = jnp.dtype(orig_dtype if compute_dtype is None else compute_dtype)
    sublane = 16 if cdt == jnp.dtype(jnp.bfloat16) else 8

    tm = _choose_row_tile(M, sublane, max_tm)
    Mpad = pl.cdiv(M, tm) * tm

    x2d = x.reshape(M, d_model).astype(cdt)
    if Mpad != M:
        x2d = jnp.pad(x2d, ((0, Mpad - M), (0, 0)))

    # Matmul operands in compute dtype; biases stay f32 for the f32 epilogue.
    w1c = w1.astype(cdt)
    w2c = w2.astype(cdt)
    b1f = b1.astype(jnp.float32).reshape(1, d_ff)
    b2f = b2.astype(jnp.float32).reshape(1, d_model)

    grid = (Mpad // tm,)

    # Explicit VMEM budget: single-buffered resident weights + double-buffered
    # x / out tiles + the f32 intermediate.  Clamp to stay within v7x's 64 MiB.
    nbytes = lambda a: a.size * a.dtype.itemsize
    budget = (nbytes(w1c) + nbytes(w2c) + nbytes(b1f) + nbytes(b2f)
              + 2 * tm * d_model * cdt.itemsize                       # x tiles
              + 2 * tm * d_model * jnp.dtype(orig_dtype).itemsize     # out tiles
              + tm * d_ff * 4)                                        # f32 h
    vmem_limit = int(min(max(2 * budget, 16 * 1024 * 1024), 64 * 1024 * 1024))

    # Weights/biases: constant block index -> keep resident, single-buffered.
    def resident(shape):
        return pl.BlockSpec(shape, lambda i: (0, 0),
                            pipeline_mode=pl.Buffered(1))

    out2d = pl.pallas_call(
        ffn_kernel,
        out_shape=jax.ShapeDtypeStruct((Mpad, d_model), orig_dtype),
        grid_spec=pltpu.PrefetchScalarGridSpec(
            num_scalar_prefetch=0,
            grid=grid,
            in_specs=[
                pl.BlockSpec((tm, d_model), lambda i: (i, 0)),  # x row tile
                resident((d_model, d_ff)),                       # w1
                resident((1, d_ff)),                             # b1 (f32)
                resident((d_ff, d_model)),                       # w2
                resident((1, d_model)),                          # b2 (f32)
            ],
            out_specs=pl.BlockSpec((tm, d_model), lambda i: (i, 0)),
        ),
        compiler_params=pltpu.CompilerParams(
            dimension_semantics=("parallel",),
            vmem_limit_bytes=vmem_limit,
        ),
    )(x2d, w1c, b1f, w2c, b2f)

    if Mpad != M:
        out2d = out2d[:M]
    return out2d.reshape(batch, seq, d_model)


if __name__ == "__main__":
    # Module shapes: d_model=32, d_ff=64; input (batch=2, seq=8, d_model=32).
    d_model, d_ff = 32, 64
    batch, seq = 2, 8

    key = jax.random.PRNGKey(0)
    kx, k1, k2, k3, k4 = jax.random.split(key, 5)

    x = jax.random.normal(kx, (batch, seq, d_model), dtype=jnp.float32)

    # nn.Linear-style deterministic init: U(-1/sqrt(fan_in), 1/sqrt(fan_in))
    bound1 = 1.0 / (d_model ** 0.5)
    w1 = jax.random.uniform(k1, (d_model, d_ff), jnp.float32, -bound1, bound1)
    b1 = jax.random.uniform(k2, (d_ff,), jnp.float32, -bound1, bound1)
    bound2 = 1.0 / (d_ff ** 0.5)
    w2 = jax.random.uniform(k3, (d_ff, d_model), jnp.float32, -bound2, bound2)
    b2 = jax.random.uniform(k4, (d_model,), jnp.float32, -bound2, bound2)

    # Plain-JAX reference (eval-mode semantics: dropout == identity).
    ref = jnp.maximum(x.reshape(-1, d_model) @ w1 + b1, 0.0) @ w2 + b2
    ref = ref.reshape(batch, seq, d_model)

    # f32 path (exact semantics of the PyTorch module's forward).
    out = positionwise_ffn(x, w1, b1, w2, b2)
    jax.block_until_ready(out)
    assert out.shape == x.shape
    assert jnp.allclose(out, ref, atol=1e-5, rtol=1e-5)

    # bf16 MXU fast path (production recommendation): f32 accumulate + f32
    # bias/ReLU epilogue, output cast back to f32.  Looser tolerance.
    out_bf16 = positionwise_ffn(x, w1, b1, w2, b2, compute_dtype=jnp.bfloat16)
    jax.block_until_ready(out_bf16)
    assert jnp.allclose(out_bf16, ref, atol=1e-1, rtol=1e-1)

    print("KERNEL_OK")
</pallas_src>

<mosaic_0001>
module attributes {stable_mosaic.version = 11 : i64} {
  func.func @ffn_kernel(%arg0: i32, %arg1: memref<8x32xf32, #tpu.memory_space<vmem>>, %arg2: memref<32x64xf32, #tpu.memory_space<vmem>>, %arg3: memref<1x64xf32, #tpu.memory_space<vmem>>, %arg4: memref<64x32xf32, #tpu.memory_space<vmem>>, %arg5: memref<1x32xf32, #tpu.memory_space<vmem>>, %arg6: memref<8x32xf32, #tpu.memory_space<vmem>>) attributes {dimension_semantics = [#tpu.dimension_semantics<parallel>], iteration_bounds = array<i64: 2>, scalar_prefetch = 0 : i64, scratch_operands = 0 : i64, tpu.core_type = #tpu.core_type<tc>, window_params = [{transform_indices = @transform_0, window_bounds = array<i64: 8, 32>}, {pipeline_mode = #tpu.pipeline_mode<synchronous>, transform_indices = @transform_1, window_bounds = array<i64: 32, 64>}, {pipeline_mode = #tpu.pipeline_mode<synchronous>, transform_indices = @transform_2, window_bounds = array<i64: 1, 64>}, {pipeline_mode = #tpu.pipeline_mode<synchronous>, transform_indices = @transform_3, window_bounds = array<i64: 64, 32>}, {pipeline_mode = #tpu.pipeline_mode<synchronous>, transform_indices = @transform_4, window_bounds = array<i64: 1, 32>}, {transform_indices = @transform_5, window_bounds = array<i64: 8, 32>}]} {
    %c0 = arith.constant 0 : index
    %c0_0 = arith.constant 0 : index
    %0 = vector.load %arg1[%c0, %c0_0] : memref<8x32xf32, #tpu.memory_space<vmem>>, vector<8x32xf32>
    %c0_1 = arith.constant 0 : index
    %c0_2 = arith.constant 0 : index
    %1 = vector.load %arg2[%c0_1, %c0_2] : memref<32x64xf32, #tpu.memory_space<vmem>>, vector<32x64xf32>
    %cst = arith.constant dense<0.000000e+00> : vector<8x64xf32>
    %2 = tpu.matmul %0, %1, %cst {dimension_numbers = #tpu.dot_dimension_numbers<[1], [0], [0], [1], [0, 0, 1, 1], [], []>} : vector<8x32xf32>, vector<32x64xf32>, vector<8x64xf32> -> vector<8x64xf32>
    %c0_3 = arith.constant 0 : index
    %c0_4 = arith.constant 0 : index
    %3 = vector.load %arg3[%c0_3, %c0_4] : memref<1x64xf32, #tpu.memory_space<vmem>>, vector<1x64xf32>
    %4 = vector.broadcast %3 : vector<1x64xf32> to vector<8x64xf32>
    %5 = arith.addf %2, %4 : vector<8x64xf32>
    %cst_5 = arith.constant 0.000000e+00 : f32
    %6 = vector.broadcast %cst_5 : f32 to vector<8x64xf32>
    %7 = arith.maximumf %5, %6 : vector<8x64xf32>
    %c0_6 = arith.constant 0 : index
    %c0_7 = arith.constant 0 : index
    %8 = vector.load %arg4[%c0_6, %c0_7] : memref<64x32xf32, #tpu.memory_space<vmem>>, vector<64x32xf32>
    %cst_8 = arith.constant dense<0.000000e+00> : vector<8x32xf32>
    %9 = tpu.matmul %7, %8, %cst_8 {dimension_numbers = #tpu.dot_dimension_numbers<[1], [0], [0], [1], [0, 0, 1, 1], [], []>} : vector<8x64xf32>, vector<64x32xf32>, vector<8x32xf32> -> vector<8x32xf32>
    %c0_9 = arith.constant 0 : index
    %c0_10 = arith.constant 0 : index
    %10 = vector.load %arg5[%c0_9, %c0_10] : memref<1x32xf32, #tpu.memory_space<vmem>>, vector<1x32xf32>
    %11 = vector.broadcast %10 : vector<1x32xf32> to vector<8x32xf32>
    %12 = arith.addf %9, %11 : vector<8x32xf32>
    %c0_11 = arith.constant 0 : index
    %c0_12 = arith.constant 0 : index
    %13 = vector.load %arg6[%c0_11, %c0_12] : memref<8x32xf32, #tpu.memory_space<vmem>>, vector<8x32xf32>
    tpu.vector_store %arg6[%c0_11, %c0_12], %12 {strides = array<i32>} : memref<8x32xf32, #tpu.memory_space<vmem>>, vector<8x32xf32>,
    return
  }
  func.func @transform_0(%arg0: i32) -> (i32, i32) {
    %c0_i32 = arith.constant 0 : i32
    %c0_i32_0 = arith.constant 0 : i32
    return %arg0, %c0_i32 : i32, i32
  }
  func.func @transform_1(%arg0: i32) -> (i32, i32) {
    %c0_i32 = arith.constant 0 : i32
    %c0_i32_0 = arith.constant 0 : i32
    %c0_i32_1 = arith.constant 0 : i32
    return %c0_i32, %c0_i32_0 : i32, i32
  }
  func.func @transform_2(%arg0: i32) -> (i32, i32) {
    %c0_i32 = arith.constant 0 : i32
    %c0_i32_0 = arith.constant 0 : i32
    %c0_i32_1 = arith.constant 0 : i32
    return %c0_i32, %c0_i32_0 : i32, i32
  }
  func.func @transform_3(%arg0: i32) -> (i32, i32) {
    %c0_i32 = arith.constant 0 : i32
    %c0_i32_0 = arith.constant 0 : i32
    %c0_i32_1 = arith.constant 0 : i32
    return %c0_i32, %c0_i32_0 : i32, i32
  }
  func.func @transform_4(%arg0: i32) -> (i32, i32) {
    %c0_i32 = arith.constant 0 : i32
    %c0_i32_0 = arith.constant 0 : i32
    %c0_i32_1 = arith.constant 0 : i32
    return %c0_i32, %c0_i32_0 : i32, i32
  }
  func.func @transform_5(%arg0: i32) -> (i32, i32) {
    %c0_i32 = arith.constant 0 : i32
    %c0_i32_0 = arith.constant 0 : i32
    return %arg0, %c0_i32 : i32, i32
  }
}

</mosaic_0001>

<bundles_post_ra>
// kernel: tpu_custom_call.1
= control target key start
LH: loop header
LB: loop body
LE: loop exit
PB: predicated region body
PF: predicated region fallthrough
CT: control target
= control target key end

     0   :  { %10 = vsyncpa [#allocation3], 0  ;;  %s803_s0 = inlined_call_operand.vmem [shape: f32[16,32], index: 0, kind: input, shape index: {}]   ;;  %s804_s1 = inlined_call_operand.vmem [shape: f32[32,64], index: 1, kind: input, shape index: {}]   ;;  %s805_s2 = inlined_call_operand.vmem [shape: f32[1,64], index: 2, kind: input, shape index: {}]   ;;  %s806_s3 = inlined_call_operand.vmem [shape: f32[64,32], index: 3, kind: input, shape index: {}]   ;;  %s807_s4 = inlined_call_operand.vmem [shape: f32[1,32], index: 4, kind: input, shape index: {}]   ;;  %s808_s5 = inlined_call_operand.hbm [shape: f32[16,32], index: 5, kind: output, shape index: {}]  }
   0x1   :  { %12 = vsyncpa [#allocation3 + $0x1], 0  ;;  %s664_s18 = smov 0   ;;  %s666_s19 = smov 0  }
   0x2   :  { %s668_s20 = smov 0   ;;  %s670_s21 = smov 0  }
   0x3 LB: > { %s685_s22 = sadd.s32 4294967295, %s629_s21   ;;  %s470_s23 = sadd.s32 4294967294, %s629_s21   ;;  %s629_s21 = sphi %s670_s21, %s814_s21   ;;  %s625_s20 = sphi %s668_s20, %s813_s20   ;;  %s621_s19 = sphi %s666_s19, %s812_s19   ;;  %s617_s18 = sphi %s664_s18, %s811_s18  }
   0x4   : > { %s689_s24 = sadd.s32 1, %s629_s21   ;;  %s135_s25 = sadd.s32 1, %s625_s20 }
   0x5   : > { %s132_s26 = ssub.s32 %s629_s21, %s689_s24  ;;  %p145_p0 = scmp.ne.s32.totalorder %s625_s20, %s621_s19 }
   0x6   : > { %p133_p1 = scmp.eq.s32.totalorder %s132_s26, 0  ;;  %p146_p2 = scmp.eq.s32.totalorder %s685_s22, 1 }
   0x7   : > { %p151_p3 = scmp.ne.s32.totalorder %s621_s19, %s617_s18  ;;  %p152_p4 = scmp.eq.s32.totalorder %s470_s23, 1 }
   0x8   : > { %s700_s27 = scalar_select %p133_p1, %s625_s20, %s135_s25  }
   0x9   : > { %p702_p5 = por %p146_p2, %p145_p0  ;;  %p706_p6 = por %p152_p4, %p151_p3 }
   0xa   : > { %p473_p7 = scmp.ge.s32.totalorder %s629_s21, 1  ;;  %p189_p8 = scmp.lt.s32.totalorder %s629_s21, 3 }
   0xc   : > { %p190_p9 = pnand %p473_p7, %p189_p8 }
   0xd   : > { %p216_p10 = scmp.lt.s32.totalorder (!%p190_p9), %s685_s22, 1  ;;  %s213_s26 = sand.u32 (!%p190_p9), 1, %s621_s19  }
   0xe   : > { %193 = sbr.rel (%p190_p9) target bundleno = 433 (0x1b1), region = 40  ;;  %s474_s30 = sshll.u32 (!%p190_p9), %s213_s26, 3 }
   0xf   : > { %s481_s8 = sshll.u32 (!%p190_p9), %s685_s22, 7  ;;  %s215_s9 = scalar_lea.vmem (!%p190_p9), [#allocation2], %s474_s30 }
  0x10   : > { %s411_s10 = sshll.u32 (!%p190_p9), %s215_s9, 4  ;;  %s767_s13 = scalar_lea.hbm (!%p190_p9), %s808_s5, %s481_s8  ;;  %s412_s10 = int_to_ptr.vmem [resolvable:$true] %s411_s10 }
  0x11   : > { %s398_s14 = scalar_lea.sflag (!%p190_p9), [#allocation3], %s213_s26  ;;  %s569_s15 = scalar_lea.vmem (!%p190_p9), %s412_s10, 128 }
  0x12   : > { %p570_p11 = scmp.ne.s32.totalorder (!%p190_p9), %s412_s10, %s569_s15 }
  0x13   : > { %v224_v0 = vld [vmem:[%s804_s1 + $0x18] sm:$0xff]  ;;  %v631_v1 = vmov 0.0   ;;  %v223_v2 = vld [vmem:[%s804_s1 + $0x10] sm:$0xff]  ;;  %vm632_vm0 = vmmov 0   ;;  %s217_s11 = scalar_select %p216_p10, %s685_s22, 1  ;;  %v222_v5 = vld [vmem:[%s804_s1 + $0x8] sm:$0xff] }
  0x14   : > { %498 = vmatprep.subr.mxu0 %v631_v1  ;;  %506 = vmatprep.mubr.msk.f32.mxu0 %vm632_vm0, %v631_v1  ;;  %v314_v3 = vld [vmem:[%s806_s3 + $0x38] sm:$0xff]  ;;  %v313_v4 = vld [vmem:[%s806_s3 + $0x30] sm:$0xff]  ;;  %v312_v6 = vld [vmem:[%s806_s3 + $0x28] sm:$0xff]  ;;  %vm232_vm1 = vcmask 261120   ;;  %vm322_vm2 = vcmask 523264   ;;  %p571_p12 = pnand %p570_p11, %p702_p5  ;;  %s633_s22 = smov [#allocation2]  }
  0x15   : > { %499 = vmatpush3.msra.mxu0 %v224_v0  ;;  %509 = vmatprep.subr.mxu1 %v631_v1  ;;  %s475_s16 = sshll.u32 %s217_s11, 3  ;;  %v221_v7 = vld [vmem:[%s804_s1] sm:$0xff]  ;;  %v310_v10 = vld [vmem:[%s806_s3 + $0x18] sm:$0xff]  ;;  %v309_v11 = vld [vmem:[%s806_s3 + $0x10] sm:$0xff] }
  0x16   : > { %500 = vmatprep.subr.mxu0 %v631_v1  ;;  %510 = vmatpush3.msra.mxu1 %v314_v3  ;;  %s219_s7 = scalar_lea.vmem %s803_s0, %s475_s16  ;;  %v311_v9 = vld [vmem:[%s806_s3 + $0x20] sm:$0xff]  ;;  %v308_v12 = vld [vmem:[%s806_s3 + $0x8] sm:$0xff]  ;;  %p572_p13 = pneg %p571_p12 }
  0x17   : > { %501 = vmatpush3.msra.mxu0 %v223_v2  ;;  %511 = vmatprep.subr.mxu1 %v631_v1  ;;  %v220_v8 = vld [vmem:[%s219_s7] sm:$0xff]  ;;  %s573_s16 = sshll.u32 %s633_s22, 4  ;;  %s574_s16 = int_to_ptr.vmem [resolvable:$false] %s573_s16 }
  0x18   : > { %502 = vmatprep.subr.mxu0 %v631_v1  ;;  %512 = vmatpush3.msra.mxu1 %v313_v4  ;;  %v307_v13 = vld [vmem:[%s806_s3] sm:$0xff]  ;;  %s575_s17 = scalar_lea.vmem %s574_s16, 256  ;;  %p576_p0 = scmp.lt.s32.totalorder %s412_s10, %s574_s16 }
  0x19   : > { %503 = vmatpush3.msra.mxu0 %v222_v5  ;;  %513 = vmatprep.subr.mxu1 %v631_v1  ;;  %v476_v14 = vld [vmem:[%s805_s2] ss:$0 sm:$0xff]  ;;  %p577_p1 = scmp.lt.s32.totalorder %s575_s17, %s569_s15 }
  0x1a   : > { %504 = vmatprep.subr.mxu0 %v631_v1  ;;  %514 = vmatpush3.msra.mxu1 %v312_v6  ;;  %v478_v19 = vld [vmem:[%s807_s4] ss:$0 sm:$0xff] }
  0x1b   : > { %505 = vmatpush3.msra.mxu0 %v221_v7  ;;  %515 = vmatprep.subr.mxu1 %v631_v1  ;;  %p578_p2 = por %p577_p1, %p576_p0 }
  0x1c   : > { %507 = vmatmul.mubr.msk.f32.vlgmr.msra.gmra.mxu0 %vm232_vm1, %v220_v8  ;;  %516 = vmatpush3.msra.mxu1 %v311_v9 }
  0x1d   : > { %517 = vmatprep.subr.mxu1 %v631_v1  ;;  %525 = vmatprep.mubr.msk.f32.mxu1 %vm632_vm0, %v631_v1  ;;  %p579_p3 = pnand %p578_p2, %p572_p13 }
  0x1e   : > { %518 = vmatpush3.msra.mxu1 %v310_v10 }
  0x1f   : > { %519 = vmatprep.subr.mxu1 %v631_v1 }
  0x20   : > { %520 = vmatpush3.msra.mxu1 %v309_v11 }
  0x21   : > { %521 = vmatprep.subr.mxu1 %v631_v1 }
  0x22   : > { %522 = vmatpush3.msra.mxu1 %v308_v12 }
  0x23   : > { %523 = vmatprep.subr.mxu1 %v631_v1 }
  0x24   : > { %524 = vmatpush3.msra.mxu1 %v307_v13 }
  0xdc   : > { %v302_v15 = vpop.f32.mrf.mxu0 }
  0xdd   : > { %v303_v16 = vadd.f32 %v476_v14, %v302_v15 }
  0xde   : > { %v508_v17 = vpop.f32.mrf.mxu0 }
  0xdf   : > { %v306_v18 = vmax.f32 %v303_v16, 0.0 }
  0xe1   : > { %526 = vmatmul.mubr.msk.f32.vlgmr.msra.gmra.mxu1 %vm322_vm2, %v306_v18 }
 0x1a1   : > { %v392_v20 = vpop.f32.mrf.mxu1 }
 0x1a2   : > { %v393_v21 = vadd.f32 %v478_v19, %v392_v20 }
 0x1a3   : > { %v527_v22 = vpop.f32.mrf.mxu1 }
 0x1a4   : > { %396 = vst.msk [vmem:[%s215_s9] sm:$0xff] %vm232_vm1, %v393_v21 }
 0x1a5   : > { %582 = shalt.err (!%p579_p3)
}
 0x1a6   : > { %s583_s23 = scalar_lea.hbm %s767_s13, 128  ;;  %s587_s30 = scalar_lea.hbm %s808_s5, 256 }
 0x1a7   : > { %p584_p4 = scmp.ne.s32.totalorder %s767_s13, %s583_s23  ;;  %p588_p9 = scmp.lt.s32.totalorder %s767_s13, %s808_s5 }
 0x1a8   : > { %p589_p10 = scmp.lt.s32.totalorder %s587_s30, %s583_s23 }
 0x1a9   : > { %p585_p7 = pnand %p584_p4, %p702_p5 }
 0x1aa   : > { %p590_p11 = por %p589_p10, %p588_p9 }
 0x1ab   : > { %p586_p8 = pneg %p585_p7 }
 0x1ad   : > { %p591_p12 = pnand %p590_p11, %p586_p8 }
 0x1af   : > { %594 = shalt.err (!%p591_p12)
}
 0x1b0   : > { %528 = dma.vmem_to_hbm [thread:$0]  (%p702_p5), %s412_s10, 128, %s767_s13, %s398_s14  }
 0x1b1 PF: > { %p534_p13 = scmp.ge.s32.totalorder %s629_s21, 2  ;;  %s423_s8 = sand.u32 1, %s617_s18  }
 0x1b2   : > { %s424_s9 = scalar_lea.sflag [#allocation3], %s423_s8 }
 0x1b3   : > { %p531_p0 = pnand %p534_p13, %p706_p6 }
 0x1b5   : > { %p532_p1 = pneg %p531_p0 }
 0x1b7   : > { %612 = dma.done.wait (%p532_p1), %s424_s9, 128  }
 0x1b8   : > { %614 = vsyncadd (%p532_p1), %s424_s9, 4294967168  ;;  %p15_p2 = scmp.ge.s32.totalorder %s689_s24, 4   ;;  %s811_s18 = smov %s621_s19 }
 0x1b9   : > { %s812_s19 = smov %s625_s20  ;;  %s813_s20 = smov %s700_s27 }
 0x1ba   : > { %s814_s21 = smov %s689_s24  ;;  %17 = sbr.rel (!%p15_p2) target bundleno = 3 (0x3), region = 75 }
 0x1bf   :  { %429 = vsyncpa [#allocation3], 1 }
 0x1c0   :  { %431 = vsyncpa [#allocation3 + $0x1], 1 }

</bundles_post_ra>
